<compile_context>
chip_gen: v7x
topology: tpu7x:2x2x1
jax: 0.10.0
libtpu: 0.0.40
codegen_flags: <defaults>
</compile_context>

<pallas_src>
import jax
import jax.numpy as jnp
from jax.experimental import pallas as pl
from jax.experimental.pallas import tpu as pltpu


def _self_attention_kernel(x_ref, w_ref, lens_ref, out_ref):
    # x_ref:    VMEM (TB, S, Dp)  input dtype (NOT upcast)
    # w_ref:    VMEM (1, Dp)      input dtype
    # lens_ref: VMEM (TB, 1)      int32
    # out_ref:  VMEM (TB, Dp)     input dtype
    x = x_ref[...]                                   # native dtype block
    w = w_ref[...]                                   # (1, Dp), native dtype

    # Linear scorer per position: multiply in the input dtype, accumulate the
    # lane (D) reduction in f32.  Lane-dense (TB, S) result.
    scores = jnp.sum(x * w, axis=-1, dtype=jnp.float32)            # (TB, S)

    # Length masking with a large finite negative.  NOTE: rows with lens == 0
    # (only the internally padded rows here) get a uniform softmax instead of
    # torch's NaN from true -inf masking.
    lens = lens_ref[...]                                            # (TB, 1)
    pos = jax.lax.broadcasted_iota(jnp.int32, scores.shape, 1)      # (TB, S)
    scores = jnp.where(pos < lens, scores, jnp.float32(-1e30))

    # Softmax over the sequence (last / lane axis).
    m = jnp.max(scores, axis=-1, keepdims=True)                     # (TB, 1)
    e = jnp.exp(scores - m)                                         # (TB, S)
    denom = jnp.sum(e, axis=-1, keepdims=True)                      # (TB, 1)

    # Reciprocal on the EUP + one Newton-Raphson step (~full f32 accuracy),
    # folded into the probabilities so the context needs no extra scale pass.
    inv = pl.reciprocal(denom, approx=True)
    inv = inv * (2.0 - denom * inv)                                 # (TB, 1)
    p = (e * inv).astype(x.dtype)                                   # (TB, S)

    # Context: weighted sum over S.  Multiply in the input dtype, accumulate in
    # f32, single cast at the store.  No f32 copy of the block is materialized.
    ctx = jnp.sum(p[:, :, None] * x, axis=1, dtype=jnp.float32)     # (TB, Dp)
    out_ref[...] = ctx.astype(out_ref.dtype)


def _vmem_limit_bytes():
    """Generation-aware VMEM limit: 3/4 of physical capacity.

    v5e/v6e (128 MiB) -> 96 MiB; v7x (64 MiB) -> 48 MiB.  Falls back to a
    conservative 48 MiB if the hardware query is unavailable.
    """
    phys = None
    try:
        phys = getattr(pltpu.get_tpu_info(), "vmem_capacity_bytes", None)
    except Exception:
        phys = None
    if not phys:
        phys = 64 * 1024 * 1024
    return int(phys) * 3 // 4


def _pick_block_b(B, S, Dp, itemsize, vmem_limit):
    """Largest sublane-aligned batch tile whose *real* working set fits.

    Working set per batch row (bytes) inside one grid step:
      2 * S*Dp*itemsize   double-buffered input block
    + 2 * S*Dp*4          ~two block-sized f32 in-kernel temporaries (worst case)
    + small (.,S)/(.,Dp)  score / probability / context vectors
    budgeted against half the VMEM limit (headroom for the output double-buffer
    and compiler scratch).
    """
    sublane = {4: 8, 2: 16, 1: 32}.get(itemsize, 8)
    b_up = pl.cdiv(B, sublane) * sublane

    per_row = 2 * S * Dp * itemsize + 2 * S * Dp * 4 + 8 * (S + Dp) * 4
    budget = vmem_limit // 2
    cap = max(sublane, (budget // per_row) // sublane * sublane)

    # Keep >= 2 grid steps whenever the padded batch allows it, so the single
    # "parallel" axis splits across v7x's two TensorCores and the input/output
    # DMAs overlap compute on every generation.
    if b_up >= 2 * sublane:
        cap = min(cap, max(sublane, (b_up // 2) // sublane * sublane))

    return int(min(cap, b_up))


def self_attention(input_seq, lens, weight, bias=None):
    """input_seq: (B, S, D); lens: (B,) int; weight: (1, D); bias: (1,) —
    dropped (softmax is shift-invariant, so the scalar bias cancels exactly)."""
    del bias
    B, S, D = input_seq.shape
    dtype = input_seq.dtype
    itemsize = jnp.dtype(dtype).itemsize

    Dp = 128 * pl.cdiv(D, 128)                     # lane-dense feature dim
    vmem_limit = _vmem_limit_bytes()
    TB = _pick_block_b(B, S, Dp, itemsize, vmem_limit)
    num_blocks = pl.cdiv(B, TB)
    Bp = TB * num_blocks                           # TB-divisible padded batch

    x = input_seq
    if Dp != D or Bp != B:
        # Zero padding: padded feature columns contribute 0 to scores/context;
        # padded batch rows get lens=0 and are sliced off below.
        x = jnp.pad(x, ((0, Bp - B), (0, 0), (0, Dp - D)))
    w = weight.astype(dtype)
    if Dp != D:
        w = jnp.pad(w, ((0, 0), (0, Dp - D)))
    lens_2d = lens.astype(jnp.int32).reshape(B, 1)
    if Bp != B:
        lens_2d = jnp.pad(lens_2d, ((0, Bp - B), (0, 0)))

    cost = pl.CostEstimate(
        flops=4 * B * S * D,
        transcendentals=B * S + B,
        bytes_accessed=(B * S * D + B * D + D) * itemsize + B * 4,
    )

    grid_spec = pltpu.PrefetchScalarGridSpec(
        num_scalar_prefetch=0,
        grid=(num_blocks,),
        in_specs=[
            pl.BlockSpec((TB, S, Dp), lambda i: (i, 0, 0)),   # input block
            pl.BlockSpec((1, Dp), lambda i: (0, 0)),          # scorer weight
            pl.BlockSpec((TB, 1), lambda i: (i, 0)),          # lens block
        ],
        out_specs=pl.BlockSpec((TB, Dp), lambda i: (i, 0)),   # lane-dense output
    )

    out = pl.pallas_call(
        _self_attention_kernel,
        out_shape=jax.ShapeDtypeStruct((Bp, Dp), dtype),
        grid_spec=grid_spec,
        compiler_params=pltpu.CompilerParams(
            dimension_semantics=("parallel",),
            vmem_limit_bytes=vmem_limit,
        ),
        cost_estimate=cost,
    )(x, w, lens_2d)

    return out[:B, :D]


def _reference(input_seq, lens, weight, bias):
    # Pure-JAX reference matching the PyTorch forward (is_train=False).
    B, S, D = input_seq.shape
    scores = jnp.einsum("bsd,d->bs", input_seq, weight[0]) + bias[0]   # (B, S)
    pos = jnp.arange(S)[None, :]
    scores = jnp.where(pos < lens[:, None], scores, -jnp.inf)
    scores = jax.nn.softmax(scores, axis=1)
    return jnp.einsum("bs,bsd->bd", scores, input_seq)


if __name__ == "__main__":
    B, S, D = 2, 8, 32
    key = jax.random.PRNGKey(0)
    k_x, k_w, k_b = jax.random.split(key, 3)

    input_seq = jax.random.normal(k_x, (B, S, D), dtype=jnp.float32)
    lens = jnp.array([S, 5], dtype=jnp.int32)

    # Deterministic scorer parameters (nn.Linear(d_hid, 1))
    bound = 1.0 / (D ** 0.5)
    weight = jax.random.uniform(k_w, (1, D), minval=-bound, maxval=bound,
                                dtype=jnp.float32)
    bias = jax.random.uniform(k_b, (1,), minval=-bound, maxval=bound,
                              dtype=jnp.float32)

    out = self_attention(input_seq, lens, weight, bias)
    out = jax.block_until_ready(out)

    ref = _reference(input_seq, lens, weight, bias)
    assert out.shape == (B, D)
    assert jnp.allclose(out, ref, atol=1e-4, rtol=1e-4), "mismatch vs reference"

    print("KERNEL_OK")
</pallas_src>

<mosaic_0001>
module attributes {stable_mosaic.version = 11 : i64} {
  func.func @_self_attention_kernel(%arg0: i32, %arg1: memref<8x8x128xf32, #tpu.memory_space<vmem>>, %arg2: memref<1x128xf32, #tpu.memory_space<vmem>>, %arg3: memref<8x1xi32, #tpu.memory_space<vmem>>, %arg4: memref<8x128xf32, #tpu.memory_space<vmem>>) attributes {dimension_semantics = [#tpu.dimension_semantics<parallel>], iteration_bounds = array<i64: 1>, scalar_prefetch = 0 : i64, scratch_operands = 0 : i64, tpu.core_type = #tpu.core_type<tc>, window_params = [{transform_indices = @transform_0, window_bounds = array<i64: 8, 8, 128>}, {pipeline_mode = #tpu.pipeline_mode<synchronous>, transform_indices = @transform_1, window_bounds = array<i64: 1, 128>}, {transform_indices = @transform_2, window_bounds = array<i64: 8, 1>}, {transform_indices = @transform_3, window_bounds = array<i64: 8, 128>}]} {
    %c0 = arith.constant 0 : index
    %c0_0 = arith.constant 0 : index
    %c0_1 = arith.constant 0 : index
    %0 = vector.load %arg1[%c0, %c0_0, %c0_1] : memref<8x8x128xf32, #tpu.memory_space<vmem>>, vector<8x8x128xf32>
    %c0_2 = arith.constant 0 : index
    %c0_3 = arith.constant 0 : index
    %1 = vector.load %arg2[%c0_2, %c0_3] : memref<1x128xf32, #tpu.memory_space<vmem>>, vector<1x128xf32>
    %2 = vector.shape_cast %1 : vector<1x128xf32> to vector<1x1x128xf32>
    %3 = vector.broadcast %2 : vector<1x1x128xf32> to vector<8x8x128xf32>
    %4 = arith.mulf %0, %3 : vector<8x8x128xf32>
    %cst = arith.constant dense<0.000000e+00> : vector<8x8xf32>
    %5 = vector.multi_reduction <add>, %4, %cst [2] : vector<8x8x128xf32> to vector<8x8xf32>
    %c0_4 = arith.constant 0 : index
    %c0_5 = arith.constant 0 : index
    %6 = vector.load %arg3[%c0_4, %c0_5] : memref<8x1xi32, #tpu.memory_space<vmem>>, vector<8x1xi32>
    %7 = tpu.iota {dimensions = array<i32: 1>} : vector<8x8xi32>
    %8 = vector.broadcast %6 : vector<8x1xi32> to vector<8x8xi32>
    %9 = arith.cmpi slt, %7, %8 : vector<8x8xi32>
    %cst_6 = arith.constant -1.000000e+30 : f32
    %10 = vector.broadcast %cst_6 : f32 to vector<8x8xf32>
    %11 = arith.select %9, %5, %10 : vector<8x8xi1>, vector<8x8xf32>
    %cst_7 = arith.constant dense<0xFF800000> : vector<8xf32>
    %12 = vector.multi_reduction <maximumf>, %11, %cst_7 [1] : vector<8x8xf32> to vector<8xf32>
    %13 = vector.shape_cast %12 : vector<8xf32> to vector<8x1xf32>
    %14 = vector.broadcast %13 : vector<8x1xf32> to vector<8x8xf32>
    %15 = arith.subf %11, %14 : vector<8x8xf32>
    %16 = math.exp %15 : vector<8x8xf32>
    %cst_8 = arith.constant dense<0.000000e+00> : vector<8xf32>
    %17 = vector.multi_reduction <add>, %16, %cst_8 [1] : vector<8x8xf32> to vector<8xf32>
    %18 = vector.shape_cast %17 : vector<8xf32> to vector<8x1xf32>
    %19 = tpu.reciprocal %18 {approx = true} : vector<8x1xf32> -> vector<8x1xf32>
    %20 = arith.mulf %18, %19 : vector<8x1xf32>
    %cst_9 = arith.constant 2.000000e+00 : f32
    %21 = vector.broadcast %cst_9 : f32 to vector<8x1xf32>
    %22 = arith.subf %21, %20 : vector<8x1xf32>
    %23 = arith.mulf %19, %22 : vector<8x1xf32>
    %24 = vector.broadcast %23 : vector<8x1xf32> to vector<8x8xf32>
    %25 = arith.mulf %16, %24 : vector<8x8xf32>
    %26 = vector.shape_cast %25 : vector<8x8xf32> to vector<8x8x1xf32>
    %27 = vector.broadcast %26 : vector<8x8x1xf32> to vector<8x8x128xf32>
    %28 = arith.mulf %27, %0 : vector<8x8x128xf32>
    %cst_10 = arith.constant dense<0.000000e+00> : vector<8x128xf32>
    %29 = vector.multi_reduction <add>, %28, %cst_10 [1] : vector<8x8x128xf32> to vector<8x128xf32>
    %c0_11 = arith.constant 0 : index
    %c0_12 = arith.constant 0 : index
    %30 = vector.load %arg4[%c0_11, %c0_12] : memref<8x128xf32, #tpu.memory_space<vmem>>, vector<8x128xf32>
    tpu.vector_store %arg4[%c0_11, %c0_12], %29 {strides = array<i32>} : memref<8x128xf32, #tpu.memory_space<vmem>>, vector<8x128xf32>,
    return
  }
  func.func @transform_0(%arg0: i32) -> (i32, i32, i32) {
    %c0_i32 = arith.constant 0 : i32
    %c0_i32_0 = arith.constant 0 : i32
    %c0_i32_1 = arith.constant 0 : i32
    return %arg0, %c0_i32, %c0_i32_0 : i32, i32, i32
  }
  func.func @transform_1(%arg0: i32) -> (i32, i32) {
    %c0_i32 = arith.constant 0 : i32
    %c0_i32_0 = arith.constant 0 : i32
    %c0_i32_1 = arith.constant 0 : i32
    return %c0_i32, %c0_i32_0 : i32, i32
  }
  func.func @transform_2(%arg0: i32) -> (i32, i32) {
    %c0_i32 = arith.constant 0 : i32
    %c0_i32_0 = arith.constant 0 : i32
    return %arg0, %c0_i32 : i32, i32
  }
  func.func @transform_3(%arg0: i32) -> (i32, i32) {
    %c0_i32 = arith.constant 0 : i32
    %c0_i32_0 = arith.constant 0 : i32
    return %arg0, %c0_i32 : i32, i32
  }
}

</mosaic_0001>

<bundles_post_ra>
// kernel: tpu_custom_call.1
= control target key start
LH: loop header
LB: loop body
LE: loop exit
PB: predicated region body
PF: predicated region fallthrough
CT: control target
= control target key end

     0   :  { %8 = vsyncpa [#allocation3], 0  ;;  %s461_s0 = inlined_call_operand.hbm [shape: f32[8,8,128], index: 0, kind: input, shape index: {}]   ;;  %s462_s1 = inlined_call_operand.vmem [shape: f32[1,128], index: 1, kind: input, shape index: {}]   ;;  %s463_s2 = inlined_call_operand.vmem [shape: s32[8,1], index: 2, kind: input, shape index: {}]   ;;  %s464_s3 = inlined_call_operand.hbm [shape: f32[8,128], index: 3, kind: output, shape index: {}]  }
   0x1   :  { %9 = vsyncpa [#allocation4], 0  ;;  %s349_s12 = smov [#allocation2]   ;;  %s301_s16 = scalar_lea.hbm %s461_s0, 1024 }
   0x2   :  { %s15_s13 = sshll.u32 %s349_s12, 4  ;;  %p302_p0 = scmp.ne.s32.totalorder %s461_s0, %s301_s16  ;;  %s16_s13 = int_to_ptr.vmem [resolvable:$true] %s15_s13 }
   0x3   :  { %p305_p1 = scmp.lt.u32.totalorder %s301_s16, %s461_s0 }
   0x5   :  { %p307_p2 = pnand %p305_p1, %p302_p0 }
   0x7   :  { %310 = shalt.err (!%p307_p2)
}
   0x8   :  { %s311_s21 = scalar_lea.vmem %s16_s13, 1024  ;;  %p316_p4 = scmp.lt.s32.totalorder %s16_s13, %s16_s13 }
   0x9   :  { %p312_p3 = scmp.ne.s32.totalorder %s16_s13, %s311_s21  ;;  %p317_p5 = scmp.lt.s32.totalorder %s311_s21, %s311_s21 }
   0xb   :  { %p318_p6 = por %p317_p5, %p316_p4 }
   0xd   :  { %p319_p7 = pnand %p318_p6, %p312_p3 }
   0xf   :  { %322 = shalt.err (!%p319_p7)
}
  0x10   :  { %s350_s22 = smov 128   ;;  %s351_s23 = smov 8  }
  0x11   :  { %21 = dma.hbm_to_vmem [thread:$0]  %s461_s0, 1024, %s16_s13, [#allocation3], %s350_s22, %s350_s22, %s351_s23  }
  0x12   :  { %345 = dma.done.wait [#allocation3], 1024  }
  0x13   :  { %346 = vsyncadd [#allocation3], 4294966272  ;;  %v352_v0 = vmov 0   ;;  %v386_v1 = vld [vmem:[#allocation2] sm:$0xff]  ;;  %v391_v3 = vld [vmem:[#allocation2 + $0x10] sm:$0xff]  ;;  %v69_v19 = vlaneseq  ;;  %vm115_vm0 = vcmask 1041409  }
  0x14   :  { %296 = vset.pattern.permute.xlu0 %v352_v0  ;;  %v290_v2 = vld [vmem:[%s462_s1] ss:$0 sm:$0xff]  ;;  %v395_v6 = vld [vmem:[#allocation2 + $0x8] sm:$0xff]  ;;  %v397_v7 = vld [vmem:[#allocation2 + $0x18] sm:$0xff]  ;;  %vm117_vm1 = vcmask 1042434   ;;  %vm119_vm2 = vcmask 1043459  }
  0x15   :  { %v44_v4 = vmul.f32 %v290_v2, %v386_v1  ;;  %v46_v5 = vmul.f32 %v290_v2, %v391_v3  ;;  %v45_v8 = vmul.f32 %v290_v2, %v395_v6  ;;  %v47_v9 = vmul.f32 %v290_v2, %v397_v7  ;;  %v401_v10 = vld [vmem:[#allocation2 + $0x20] sm:$0xff]  ;;  %v403_v11 = vld [vmem:[#allocation2 + $0x28] sm:$0xff]  ;;  %v407_v14 = vld [vmem:[#allocation2 + $0x30] sm:$0xff] }
  0x16   :  { %v48_v12 = vmul.f32 %v290_v2, %v401_v10  ;;  %v49_v13 = vmul.f32 %v290_v2, %v403_v11  ;;  %v409_v15 = vld [vmem:[#allocation2 + $0x38] sm:$0xff]  ;;  %v50_v16 = vmul.f32 %v290_v2, %v407_v14  ;;  %v68_v18 = vld [vmem:[%s463_s2] sm:$0xff]  ;;  %v70_v20 = vand.u32 127, %v69_v19  ;;  %s353_s2 = smov [#allocation5]  }
  0x17   :  { %52 = vadd.xlane.f32.xlu0 %v44_v4  ;;  %56 = vadd.xlane.f32.xlu1 %v46_v5  ;;  %v51_v17 = vmul.f32 %v290_v2, %v409_v15  ;;  %v416_v21 = vshrl.u32 %v69_v19, 7  ;;  %vm121_vm3 = vcmask 1044484   ;;  %vm123_vm4 = vcmask 1045509   ;;  %s281_s28 = sshll.u32 %s353_s2, 4  ;;  %s282_s28 = int_to_ptr.vmem [resolvable:$true] %s281_s28 }
  0x18   :  { %vm125_vm5 = vcmask 1046534   ;;  %vm127_vm6 = vcmask 1047559   ;;  %vm131_vm7 = vcmask 64512   ;;  %s323_s29 = scalar_lea.vmem %s282_s28, 128  ;;  %p328_p9 = scmp.lt.s32.totalorder %s282_s28, %s282_s28 }
  0x19   :  { %v85_v24 = vsub.s32 %v70_v20, %v416_v21  ;;  %v190_v59 = vsub.s32 6, %v416_v21  ;;  %v148_v60 = vsub.s32 0, %v416_v21  ;;  %v155_v0 = vsub.s32 1, %v416_v21  ;;  %p324_p8 = scmp.ne.s32.totalorder %s282_s28, %s323_s29  ;;  %p329_p10 = scmp.lt.s32.totalorder %s323_s29, %s323_s29 }
  0x1a   :  { %v162_v4 = vsub.s32 2, %v416_v21 }
  0x1b   :  { %54 = vadd.xlane.f32.xlu0 %v45_v8  ;;  %58 = vadd.xlane.f32.xlu1 %v47_v9  ;;  %v169_v8 = vsub.s32 3, %v416_v21  ;;  %p330_p11 = por %p329_p10, %p328_p9 }
  0x1d   :  { %p331_p12 = pnand %p330_p11, %p324_p8 }
  0x1f   :  { %60 = vadd.xlane.f32.xlu0 %v48_v12  ;;  %62 = vadd.xlane.f32.xlu1 %v49_v13  ;;  %v176_v12 = vsub.s32 4, %v416_v21 }
  0x23   :  { %64 = vadd.xlane.f32.xlu0 %v50_v16  ;;  %66 = vadd.xlane.f32.xlu1 %v51_v17  ;;  %v183_v16 = vsub.s32 5, %v416_v21 }
  0x39   :  { %72 = vperm.xlu0 %296, %v68_v18   ;;  %v197_v18 = vsub.s32 7, %v416_v21 }
  0xa4   :  { %v53_v22 = vpop.xlane.xlu0 %52  ;;  %v57_v23 = vpop.xlane.xlu1 %56 }
  0xa5   :  { %v94_v25 = vrot.slane %v57_v23, %v85_v24  ;;  %v86_v28 = vrot.slane %v53_v22, %v85_v24 }
  0xa8   :  { %v55_v26 = vpop.xlane.xlu0 %54  ;;  %v59_v27 = vpop.xlane.xlu1 %58 }
  0xa9   :  { %v90_v29 = vrot.slane %v55_v26, %v85_v24  ;;  %v98_v31 = vrot.slane %v59_v27, %v85_v24 }
  0xab   :  { %v116_v30 = vsel %vm115_vm0, %v90_v29, %v86_v28 }
  0xac   :  { %v118_v32 = vsel %vm117_vm1, %v94_v25, %v116_v30  ;;  %v61_v33 = vpop.xlane.xlu0 %60  ;;  %v63_v34 = vpop.xlane.xlu1 %62 }
  0xad   :  { %v102_v35 = vrot.slane %v61_v33, %v85_v24  ;;  %v120_v36 = vsel %vm119_vm2, %v98_v31, %v118_v32  ;;  %v106_v38 = vrot.slane %v63_v34, %v85_v24 }
  0xaf   :  { %v122_v39 = vsel %vm121_vm3, %v102_v35, %v120_v36 }
  0xb0   :  { %v65_v37 = vpop.xlane.xlu0 %64  ;;  %v67_v41 = vpop.xlane.xlu1 %66  ;;  %v124_v42 = vsel %vm123_vm4, %v106_v38, %v122_v39 }
  0xb1   :  { %v110_v40 = vrot.slane %v65_v37, %v85_v24  ;;  %v114_v43 = vrot.slane %v67_v41, %v85_v24 }
  0xb3   :  { %v126_v44 = vsel %vm125_vm5, %v110_v40, %v124_v42 }
  0xb4   :  { %v128_v46 = vsel %vm127_vm6, %v114_v43, %v126_v44 }
  0xb8   :  { %v73_v45 = vpop.permute.xlu0 %72 }
  0xb9   :  { %vm74_vm8 = vcmp.lt.s32.totalorder %v70_v20, %v73_v45 }
  0xba   :  { %v130_v47 = vsel %vm74_vm8, %v128_v46, -1e+30 }
  0xbb   :  { %v132_v48 = vsel %vm131_vm7, %v130_v47, -inf }
  0xbc   :  { %133 = vmax.xlane.f32.xlu1 %v132_v48 }
 0x149   :  { %v134_v49 = vpop.xlane.xlu1 %133 }
 0x14a   :  { %v135_v50 = vsub.f32 %v130_v47, %v134_v49 }
 0x14c   :  { %v136_v51 = vmul.f32 1.442695, %v135_v50 }
 0x14e   :  { %297 = vpow2.f32 %v136_v51 }
 0x158   :  { %v298_v52 = vpop.eup %297 }
 0x159   :  { %v138_v53 = vsel %vm131_vm7, %v298_v52, 0.0 }
 0x15a   :  { %139 = vadd.xlane.f32.xlu1 %v138_v53 }
 0x1e7   :  { %v140_v54 = vpop.xlane.xlu1 %139 }
 0x1e8   :  { %299 = vrcp.f32 %v140_v54 }
 0x1f2   :  { %v300_v55 = vpop.eup %299 }
 0x1f3   :  { %v142_v56 = vmul.f32 %v300_v55, %v140_v54 }
 0x1f5   :  { %v143_v57 = vsub.f32 2.0, %v142_v56 }
 0x1f7   :  { %v144_v58 = vmul.f32 %v300_v55, %v143_v57 }
 0x1f9   :  { %v145_v61 = vmul.f32 %v298_v52, %v144_v58 }
 0x1fb   :  { %v191_v62 = vrot.slane %v145_v61, %v190_v59  ;;  %v149_v63 = vrot.slane %v145_v61, %v148_v60  ;;  %v156_v2 = vrot.slane %v145_v61, %v155_v0  ;;  %v163_v5 = vrot.slane %v145_v61, %v162_v4 }
 0x1fc   :  { %v170_v9 = vrot.slane %v145_v61, %v169_v8  ;;  %v177_v13 = vrot.slane %v145_v61, %v176_v12  ;;  %v184_v17 = vrot.slane %v145_v61, %v183_v16  ;;  %v198_v19 = vrot.slane %v145_v61, %v197_v18 }
 0x1fd   :  { %193 = vbcast.lane.b32.xlu0 %v191_v62, 256  ;;  %151 = vbcast.lane.b32.xlu1 %v149_v63, 256 }
 0x201   :  { %158 = vbcast.lane.b32.xlu1 %v156_v2, 256 }
 0x205   :  { %165 = vbcast.lane.b32.xlu1 %v163_v5, 256 }
 0x209   :  { %172 = vbcast.lane.b32.xlu1 %v170_v9, 256 }
 0x20d   :  { %179 = vbcast.lane.b32.xlu1 %v177_v13, 256 }
 0x211   :  { %186 = vbcast.lane.b32.xlu1 %v184_v17, 256 }
 0x215   :  { %200 = vbcast.lane.b32.xlu1 %v198_v19, 256 }
 0x26f   :  { %v152_v20 = vpop.permute.xlu1 %151  ;;  %v194_v28 = vpop.permute.xlu0 %193 }
 0x270   :  { %v202_v22 = vmul.f32 %v152_v20, %v386_v1  ;;  %v208_v32 = vmul.f32 %v194_v28, %v407_v14 }
 0x272   :  { %v210_v26 = vrot.slane %v202_v22, 4  ;;  %v246_v1 = vrot.slane %v208_v32, 4 }
 0x273   :  { %v159_v23 = vpop.permute.xlu1 %158 }
 0x274   :  { %v203_v24 = vmul.f32 %v159_v23, %v395_v6  ;;  %v211_v21 = vadd.f32 %v210_v26, %v202_v22  ;;  %v247_v43 = vadd.f32 %v246_v1, %v208_v32 }
 0x276   :  { %v216_v25 = vrot.slane %v203_v24, 4  ;;  %v212_v37 = vrot.slane %v211_v21, 2  ;;  %v248_v52 = vrot.slane %v247_v43, 2 }
 0x277   :  { %v166_v27 = vpop.permute.xlu1 %165 }
 0x278   :  { %v204_v29 = vmul.f32 %v166_v27, %v391_v3  ;;  %v217_v30 = vadd.f32 %v216_v25, %v203_v24  ;;  %v213_v44 = vadd.f32 %v212_v37, %v211_v21  ;;  %v249_v63 = vadd.f32 %v248_v52, %v247_v43 }
 0x27a   :  { %v222_v31 = vrot.slane %v204_v29, 4  ;;  %v218_v36 = vrot.slane %v217_v30, 2  ;;  %v214_v53 = vrot.slane %v213_v44, 1  ;;  %v250_v16 = vrot.slane %v249_v63, 1 }
 0x27b   :  { %v173_v33 = vpop.permute.xlu1 %172 }
 0x27c   :  { %v223_v34 = vadd.f32 %v222_v31, %v204_v29  ;;  %v205_v35 = vmul.f32 %v173_v33, %v397_v7  ;;  %v219_v42 = vadd.f32 %v218_v36, %v217_v30  ;;  %v251_v24 = vadd.f32 %v250_v16, %v249_v63 }
 0x27e   :  { %v224_v38 = vrot.slane %v223_v34, 2  ;;  %v228_v6 = vrot.slane %v205_v35, 4  ;;  %v220_v49 = vrot.slane %v219_v42, 1 }
 0x27f   :  { %v180_v39 = vpop.permute.xlu1 %179 }
 0x280   :  { %v206_v40 = vmul.f32 %v180_v39, %v401_v10  ;;  %v229_v41 = vadd.f32 %v228_v6, %v205_v35  ;;  %v225_v45 = vadd.f32 %v224_v38, %v223_v34  ;;  %v221_v59 = vadd.f32 %v220_v49, %v219_v42 }
 0x282   :  { %v234_v3 = vrot.slane %v206_v40, 4  ;;  %v230_v14 = vrot.slane %v229_v41, 2  ;;  %v226_v54 = vrot.slane %v225_v45, 1 }
 0x283   :  { %v187_v46 = vpop.permute.xlu1 %186 }
 0x284   :  { %v235_v47 = vadd.f32 %v234_v3, %v206_v40  ;;  %v207_v48 = vmul.f32 %v187_v46, %v403_v11  ;;  %v231_v7 = vadd.f32 %v230_v14, %v229_v41  ;;  %v227_v0 = vadd.f32 %v226_v54, %v225_v45 }
 0x285   :  { %v215_v11 = vadd.f32 %v214_v53, %v213_v44 }
 0x286   :  { %v236_v50 = vrot.slane %v235_v47, 2  ;;  %v240_v51 = vrot.slane %v207_v48, 4  ;;  %v232_v10 = vrot.slane %v231_v7, 1 }
 0x287   :  { %v201_v55 = vpop.permute.xlu1 %200  ;;  %v266_v9 = vsel %vm115_vm0, %v221_v59, %v215_v11 }
 0x288   :  { %v237_v56 = vadd.f32 %v236_v50, %v235_v47  ;;  %v241_v57 = vadd.f32 %v240_v51, %v207_v48  ;;  %v209_v58 = vmul.f32 %v201_v55, %v409_v15  ;;  %v233_v2 = vadd.f32 %v232_v10, %v231_v7 }
 0x289   :  { %v267_v17 = vsel %vm117_vm1, %v227_v0, %v266_v9 }
 0x28a   :  { %v238_v60 = vrot.slane %v237_v56, 1  ;;  %v242_v61 = vrot.slane %v241_v57, 2  ;;  %v252_v62 = vrot.slane %v209_v58, 4  ;;  %v268_v15 = vsel %vm119_vm2, %v233_v2, %v267_v17 }
 0x28c   :  { %v243_v4 = vadd.f32 %v242_v61, %v241_v57  ;;  %v253_v5 = vadd.f32 %v252_v62, %v209_v58  ;;  %v239_v8 = vadd.f32 %v238_v60, %v237_v56 }
 0x28e   :  { %v244_v12 = vrot.slane %v243_v4, 1  ;;  %v254_v13 = vrot.slane %v253_v5, 2  ;;  %v269_v20 = vsel %vm121_vm3, %v239_v8, %v268_v15 }
 0x290   :  { %v245_v18 = vadd.f32 %v244_v12, %v243_v4  ;;  %v255_v19 = vadd.f32 %v254_v13, %v253_v5 }
 0x292   :  { %v256_v22 = vrot.slane %v255_v19, 1  ;;  %v270_v23 = vsel %vm123_vm4, %v245_v18, %v269_v20 }
 0x293   :  { %v271_v26 = vsel %vm125_vm5, %v251_v24, %v270_v23 }
 0x294   :  { %v257_v25 = vadd.f32 %v256_v22, %v255_v19 }
 0x296   :  { %v272_v27 = vsel %vm127_vm6, %v257_v25, %v271_v26 }
 0x297   :  { %274 = vst [vmem:[#allocation5] sm:$0xff] %v272_v27 }
 0x298   :  { %334 = shalt.err (!%p331_p12)
}
 0x299   :  { %s335_s5 = scalar_lea.hbm %s464_s3, 128 }
 0x29a   :  { %p336_p13 = scmp.ne.s32.totalorder %s464_s3, %s335_s5  ;;  %p339_p0 = scmp.lt.u32.totalorder %s335_s5, %s464_s3 }
 0x29c   :  { %p341_p1 = pnand %p339_p0, %p336_p13 }
 0x29e   :  { %344 = shalt.err (!%p341_p1)
}
 0x29f   :  { %284 = dma.vmem_to_hbm [thread:$0]  %s282_s28, 128, %s464_s3, [#allocation4]  }
 0x2a0   :  { %347 = dma.done.wait [#allocation4], 128  }
 0x2a1   :  { %348 = vsyncadd [#allocation4], 4294967168 }
 0x2a2   :  { %288 = vsyncpa [#allocation3], 1 }
 0x2a3   :  { %289 = vsyncpa [#allocation4], 1 }

</bundles_post_ra>
